<compile_context>
chip_gen: v7x
topology: tpu7x:2x2x1
jax: 0.10.0
libtpu: 0.0.40
codegen_flags: <defaults>
</compile_context>

<pallas_src>
import jax
import jax.numpy as jnp
from jax.experimental import pallas as pl
from jax.experimental.pallas import tpu as pltpu


_DEFAULT_BUF_BUDGET = 8 * 1024 * 1024     # bytes per pipelined input buffer
_MAX_BUF_BUDGET = 10 * 1024 * 1024        # keep 2x buffers well under the limit
_VMEM_LIMIT_BYTES = 32 * 1024 * 1024      # explicit scoped-VMEM request


# ---------------------------------------------------------------------------
# Batched single-tile kernel: TB batch elements per grid step, fused MLP.
# ---------------------------------------------------------------------------
def _make_batched_kernel(tb, hw):
    inv_hw = 1.0 / float(hw)

    def kernel(x_ref, w1t_ref, w2t_ref, o_ref):
        # x_ref  : (TB, C, HW)  TB batch elements in native channel-major layout.
        # w1t_ref: (C, Cr)      fc1 weight transposed.
        # w2t_ref: (Cr, C)      fc2 weight transposed.
        # o_ref  : (TB, C)      sigmoid(channel attention).
        x = x_ref[...].astype(jnp.float32)                     # (TB, C, HW)
        avg = jnp.sum(x, axis=-1) * jnp.float32(inv_hw)        # (TB, C)
        mx = jnp.max(x, axis=-1)                               # (TB, C)

        # Fused MLP: one pass of fc1/relu/fc2 over [avg ; max] (2*TB rows).
        p = jnp.concatenate([avg, mx], axis=0)                 # (2*TB, C)
        w1t = w1t_ref[...].astype(jnp.float32)
        w2t = w2t_ref[...].astype(jnp.float32)
        h = jnp.maximum(
            jnp.dot(p, w1t, preferred_element_type=jnp.float32), 0.0)  # (2*TB, Cr)
        o = jnp.dot(h, w2t, preferred_element_type=jnp.float32)        # (2*TB, C)
        att = jax.nn.sigmoid(o[:tb] + o[tb:])                  # (TB, C)
        o_ref[...] = att.astype(o_ref.dtype)

    return kernel


# ---------------------------------------------------------------------------
# Streaming multi-tile kernel: per-batch running sum/max over HW tiles.
# ---------------------------------------------------------------------------
def _make_streaming_kernel(hw_total, t_hw):
    needs_mask = (hw_total % t_hw) != 0
    inv_hw = 1.0 / float(hw_total)

    def kernel(x_ref, w1_ref, w2_ref, o_ref, sum_acc, max_acc):
        # x_ref : (1, C, T_HW)   w1_ref: (Cr, C)   w2_ref: (C, Cr)
        # o_ref : (1, C, 1)      sum_acc / max_acc : (C, 1) f32 scratch.
        hw_idx = pl.program_id(1)
        n_hw = pl.num_programs(1)

        @pl.when(hw_idx == 0)
        def _():
            sum_acc[...] = jnp.zeros_like(sum_acc)
            max_acc[...] = jnp.full_like(max_acc, -jnp.inf)

        # Hot loop: every tile except the last is guaranteed full -> no
        # iota/compare/select work, just the two lane reduces (hidden by DMA).
        @pl.when(hw_idx < n_hw - 1)
        def _():
            x = x_ref[0].astype(jnp.float32)                   # (C, T_HW)
            sum_acc[...] = sum_acc[...] + jnp.sum(x, axis=1, keepdims=True)
            max_acc[...] = jnp.maximum(
                max_acc[...], jnp.max(x, axis=1, keepdims=True))

        # Last tile: mask the padded tail (only if needed) and finalize.
        @pl.when(hw_idx == n_hw - 1)
        def _():
            x = x_ref[0].astype(jnp.float32)                   # (C, T_HW)
            if needs_mask:
                lane = jax.lax.broadcasted_iota(jnp.int32, x.shape, 1)
                valid = (hw_idx * t_hw + lane) < hw_total
                x_s = jnp.where(valid, x, jnp.float32(0.0))
                x_m = jnp.where(valid, x, jnp.float32(-jnp.inf))
            else:
                x_s = x
                x_m = x

            tot_sum = sum_acc[...] + jnp.sum(x_s, axis=1, keepdims=True)
            tot_max = jnp.maximum(max_acc[...],
                                  jnp.max(x_m, axis=1, keepdims=True))

            avg = tot_sum * jnp.float32(inv_hw)                # (C, 1)
            p = jnp.concatenate([avg, tot_max], axis=1)        # (C, 2)
            w1 = w1_ref[...].astype(jnp.float32)               # (Cr, C)
            w2 = w2_ref[...].astype(jnp.float32)               # (C, Cr)
            h = jnp.maximum(
                jnp.dot(w1, p, preferred_element_type=jnp.float32), 0.0)  # (Cr, 2)
            o = jnp.dot(w2, h, preferred_element_type=jnp.float32)        # (C, 2)
            att = jax.nn.sigmoid(o[:, 0:1] + o[:, 1:2])        # (C, 1)
            o_ref[0] = att.astype(o_ref.dtype)

    return kernel


# ---------------------------------------------------------------------------
# Wrapper
# ---------------------------------------------------------------------------
def channel_attention(x_nchw, w_fc1, w_fc2, *,
                      buf_budget_bytes=_DEFAULT_BUF_BUDGET):
    """x_nchw: (B, C, H, W); w_fc1: (Cr, C); w_fc2: (C, Cr)
    (PyTorch 1x1-conv weights squeezed).  Returns (B, C, 1, 1)."""
    B, C, H, W = x_nchw.shape
    Cr = w_fc1.shape[0]
    HW = H * W
    itemsize = jnp.dtype(x_nchw.dtype).itemsize

    # Free, contiguous reshape: stay in native (B, C, HW) layout.
    x_flat = x_nchw.reshape(B, C, HW)

    # Byte-budget-driven tiling.
    budget = int(max(1, min(buf_budget_bytes, _MAX_BUF_BUDGET)))
    cap = (budget // max(1, C * itemsize)) // 128 * 128   # lanes per tile
    cap = max(128, cap)

    # ---- Path selection --------------------------------------------------
    use_batched = False
    tb = 1
    if HW <= cap:
        tb_max = max(1, budget // max(1, C * HW * itemsize))
        if B <= tb_max:
            tb, use_batched = B, True
        elif tb_max >= 8:
            # Keep the (TB, C) output block sublane-aligned when splitting B.
            tb, use_batched = (tb_max // 8) * 8, True

    if use_batched:
        grid_b = pl.cdiv(B, tb)
        kernel = _make_batched_kernel(tb, HW)
        out = pl.pallas_call(
            kernel,
            out_shape=jax.ShapeDtypeStruct((B, C), x_nchw.dtype),
            grid_spec=pltpu.PrefetchScalarGridSpec(
                num_scalar_prefetch=0,
                grid=(grid_b,),
                in_specs=[
                    pl.BlockSpec((tb, C, HW), lambda b: (b, 0, 0)),
                    pl.BlockSpec((C, Cr), lambda b: (0, 0)),
                    pl.BlockSpec((Cr, C), lambda b: (0, 0)),
                ],
                out_specs=pl.BlockSpec((tb, C), lambda b: (b, 0)),
            ),
            compiler_params=pltpu.CompilerParams(
                dimension_semantics=("parallel",),
                vmem_limit_bytes=_VMEM_LIMIT_BYTES),
        )(x_flat, jnp.transpose(w_fc1), jnp.transpose(w_fc2))
        return out.reshape(B, C, 1, 1)

    # ---- Streaming multi-tile path ----------------------------------------
    t_hw = HW if HW <= cap else cap          # cap is a multiple of 128
    n_hw = pl.cdiv(HW, t_hw)
    kernel = _make_streaming_kernel(HW, t_hw)
    out = pl.pallas_call(
        kernel,
        out_shape=jax.ShapeDtypeStruct((B, C, 1), x_nchw.dtype),
        grid_spec=pltpu.PrefetchScalarGridSpec(
            num_scalar_prefetch=0,
            grid=(B, n_hw),
            in_specs=[
                pl.BlockSpec((1, C, t_hw), lambda b, h: (b, 0, h)),
                pl.BlockSpec((Cr, C), lambda b, h: (0, 0)),
                pl.BlockSpec((C, Cr), lambda b, h: (0, 0)),
            ],
            out_specs=pl.BlockSpec((1, C, 1), lambda b, h: (b, 0, 0)),
            scratch_shapes=[
                pltpu.VMEM((C, 1), jnp.float32),   # running sum
                pltpu.VMEM((C, 1), jnp.float32),   # running max
            ],
        ),
        compiler_params=pltpu.CompilerParams(
            dimension_semantics=("parallel", "arbitrary"),
            vmem_limit_bytes=_VMEM_LIMIT_BYTES),
    )(x_flat, w_fc1, w_fc2)
    return out.reshape(B, C, 1, 1)


# ---------------------------------------------------------------------------
# Pure-JAX reference + self-test
# ---------------------------------------------------------------------------
def _reference(x_nchw, w_fc1, w_fc2):
    avg = jnp.mean(x_nchw, axis=(2, 3))                  # (B, C)
    mx = jnp.max(x_nchw, axis=(2, 3))                    # (B, C)

    def mlp(p):
        h = jnp.maximum(p @ w_fc1.T, 0.0)                # (B, Cr)
        return h @ w_fc2.T                               # (B, C)

    out = jax.nn.sigmoid(mlp(avg) + mlp(mx))
    return out.reshape(out.shape[0], out.shape[1], 1, 1)


def _run_case(B, C, H, W, ratio, budget, key):
    Cr = max(1, C // ratio)
    kx, k1, k2 = jax.random.split(key, 3)
    x = jax.random.normal(kx, (B, C, H, W), dtype=jnp.float32)
    # PyTorch conv weights squeezed: fc1.weight (Cr, C, 1, 1) -> (Cr, C);
    #                                fc2.weight (C, Cr, 1, 1) -> (C, Cr).
    w_fc1 = jax.random.normal(k1, (Cr, C), dtype=jnp.float32) * 0.1
    w_fc2 = jax.random.normal(k2, (C, Cr), dtype=jnp.float32) * 0.1

    out = jax.block_until_ready(
        channel_attention(x, w_fc1, w_fc2, buf_budget_bytes=budget))
    ref = _reference(x, w_fc1, w_fc2)
    assert out.shape == (B, C, 1, 1), f"bad shape {out.shape}"
    assert jnp.allclose(out, ref, atol=1e-5, rtol=1e-5), "mismatch vs reference"


if __name__ == "__main__":
    key = jax.random.PRNGKey(0)
    k1, k2, k3 = jax.random.split(key, 3)

    # Case 1: batched single-tile path (HW = 256 in one block, TB = B = 2).
    _run_case(B=2, C=32, H=16, W=16, ratio=16, budget=_DEFAULT_BUF_BUDGET, key=k1)

    # Case 2: streaming path with a masked partial last tile
    # (budget 32 KiB -> cap = 256 lanes; HW = 289 -> 2 tiles, last has 33 valid).
    _run_case(B=2, C=32, H=17, W=17, ratio=16, budget=32 * 1024, key=k2)

    # Case 3: batched path with batch splitting + clipped edge block
    # (budget 96 KiB -> TB = 8, grid = ceil(20/8) = 3).
    _run_case(B=20, C=32, H=8, W=8, ratio=16, budget=96 * 1024, key=k3)

    print("KERNEL_OK")
</pallas_src>

<mosaic_0001>
module attributes {stable_mosaic.version = 11 : i64} {
  func.func @kernel(%arg0: i32, %arg1: memref<2x32x256xf32, #tpu.memory_space<vmem>>, %arg2: memref<32x2xf32, #tpu.memory_space<vmem>>, %arg3: memref<2x32xf32, #tpu.memory_space<vmem>>, %arg4: memref<2x32xf32, #tpu.memory_space<vmem>>) attributes {dimension_semantics = [#tpu.dimension_semantics<parallel>], iteration_bounds = array<i64: 1>, scalar_prefetch = 0 : i64, scratch_operands = 0 : i64, tpu.core_type = #tpu.core_type<tc>, window_params = [{transform_indices = @transform_0, window_bounds = array<i64: 2, 32, 256>}, {pipeline_mode = #tpu.pipeline_mode<synchronous>, transform_indices = @transform_1, window_bounds = array<i64: 32, 2>}, {pipeline_mode = #tpu.pipeline_mode<synchronous>, transform_indices = @transform_2, window_bounds = array<i64: 2, 32>}, {transform_indices = @transform_3, window_bounds = array<i64: 2, 32>}]} {
    %c0 = arith.constant 0 : index
    %c0_0 = arith.constant 0 : index
    %c0_1 = arith.constant 0 : index
    %0 = vector.load %arg1[%c0, %c0_0, %c0_1] : memref<2x32x256xf32, #tpu.memory_space<vmem>>, vector<2x32x256xf32>
    %cst = arith.constant dense<0.000000e+00> : vector<2x32xf32>
    %1 = vector.multi_reduction <add>, %0, %cst [2] : vector<2x32x256xf32> to vector<2x32xf32>
    %cst_2 = arith.constant 3.906250e-03 : f32
    %2 = vector.broadcast %cst_2 : f32 to vector<2x32xf32>
    %3 = arith.mulf %1, %2 : vector<2x32xf32>
    %cst_3 = arith.constant dense<0xFF800000> : vector<2x32xf32>
    %4 = vector.multi_reduction <maximumf>, %0, %cst_3 [2] : vector<2x32x256xf32> to vector<2x32xf32>
    %5 = tpu.concatenate %3, %4 in 0 : vector<2x32xf32>, vector<2x32xf32> -> vector<4x32xf32>
    %c0_4 = arith.constant 0 : index
    %c0_5 = arith.constant 0 : index
    %6 = vector.load %arg2[%c0_4, %c0_5] : memref<32x2xf32, #tpu.memory_space<vmem>>, vector<32x2xf32>
    %c0_6 = arith.constant 0 : index
    %c0_7 = arith.constant 0 : index
    %7 = vector.load %arg3[%c0_6, %c0_7] : memref<2x32xf32, #tpu.memory_space<vmem>>, vector<2x32xf32>
    %cst_8 = arith.constant dense<0.000000e+00> : vector<4x2xf32>
    %8 = tpu.matmul %5, %6, %cst_8 {dimension_numbers = #tpu.dot_dimension_numbers<[1], [0], [0], [1], [0, 0, 1, 1], [], []>} : vector<4x32xf32>, vector<32x2xf32>, vector<4x2xf32> -> vector<4x2xf32>
    %cst_9 = arith.constant 0.000000e+00 : f32
    %9 = vector.broadcast %cst_9 : f32 to vector<4x2xf32>
    %10 = arith.maximumf %8, %9 : vector<4x2xf32>
    %cst_10 = arith.constant dense<0.000000e+00> : vector<4x32xf32>
    %11 = tpu.matmul %10, %7, %cst_10 {dimension_numbers = #tpu.dot_dimension_numbers<[1], [0], [0], [1], [0, 0, 1, 1], [], []>} : vector<4x2xf32>, vector<2x32xf32>, vector<4x32xf32> -> vector<4x32xf32>
    %12 = vector.extract_strided_slice %11 {offsets = [0, 0], sizes = [2, 32], strides = [1, 1]} : vector<4x32xf32> to vector<2x32xf32>
    %13 = vector.extract_strided_slice %11 {offsets = [2, 0], sizes = [2, 32], strides = [1, 1]} : vector<4x32xf32> to vector<2x32xf32>
    %14 = arith.addf %12, %13 : vector<2x32xf32>
    %15 = arith.negf %14 : vector<2x32xf32>
    %16 = math.exp %15 : vector<2x32xf32>
    %cst_11 = arith.constant 1.000000e+00 : f32
    %17 = vector.broadcast %cst_11 : f32 to vector<2x32xf32>
    %18 = arith.addf %17, %16 : vector<2x32xf32>
    %19 = arith.divf %17, %18 : vector<2x32xf32>
    %c0_12 = arith.constant 0 : index
    %c0_13 = arith.constant 0 : index
    %20 = vector.load %arg4[%c0_12, %c0_13] : memref<2x32xf32, #tpu.memory_space<vmem>>, vector<2x32xf32>
    tpu.vector_store %arg4[%c0_12, %c0_13], %19 {strides = array<i32>} : memref<2x32xf32, #tpu.memory_space<vmem>>, vector<2x32xf32>,
    return
  }
  func.func @transform_0(%arg0: i32) -> (i32, i32, i32) {
    %c0_i32 = arith.constant 0 : i32
    %c0_i32_0 = arith.constant 0 : i32
    %c0_i32_1 = arith.constant 0 : i32
    return %arg0, %c0_i32, %c0_i32_0 : i32, i32, i32
  }
  func.func @transform_1(%arg0: i32) -> (i32, i32) {
    %c0_i32 = arith.constant 0 : i32
    %c0_i32_0 = arith.constant 0 : i32
    %c0_i32_1 = arith.constant 0 : i32
    return %c0_i32, %c0_i32_0 : i32, i32
  }
  func.func @transform_2(%arg0: i32) -> (i32, i32) {
    %c0_i32 = arith.constant 0 : i32
    %c0_i32_0 = arith.constant 0 : i32
    %c0_i32_1 = arith.constant 0 : i32
    return %c0_i32, %c0_i32_0 : i32, i32
  }
  func.func @transform_3(%arg0: i32) -> (i32, i32) {
    %c0_i32 = arith.constant 0 : i32
    %c0_i32_0 = arith.constant 0 : i32
    return %arg0, %c0_i32 : i32, i32
  }
}

</mosaic_0001>

<bundles_post_ra>
// kernel: tpu_custom_call.1
= control target key start
LH: loop header
LB: loop body
LE: loop exit
PB: predicated region body
PF: predicated region fallthrough
CT: control target
= control target key end

     0   :  { %8 = vsyncpa [#allocation3], 0  ;;  %s565_s0 = inlined_call_operand.hbm [shape: f32[2,32,256], index: 0, kind: input, shape index: {}]   ;;  %s566_s1 = inlined_call_operand.vmem [shape: f32[32,2], index: 1, kind: input, shape index: {}]   ;;  %s567_s2 = inlined_call_operand.vmem [shape: f32[2,32], index: 2, kind: input, shape index: {}]   ;;  %s568_s3 = inlined_call_operand.hbm [shape: f32[2,32], index: 3, kind: output, shape index: {}]  }
   0x1   :  { %9 = vsyncpa [#allocation4], 0  ;;  %s485_s12 = smov [#allocation2]   ;;  %s437_s16 = scalar_lea.hbm %s565_s0, 2048 }
   0x2   :  { %s15_s13 = sshll.u32 %s485_s12, 4  ;;  %p438_p0 = scmp.ne.s32.totalorder %s565_s0, %s437_s16  ;;  %s16_s13 = int_to_ptr.vmem [resolvable:$true] %s15_s13 }
   0x3   :  { %p441_p1 = scmp.lt.u32.totalorder %s437_s16, %s565_s0 }
   0x5   :  { %p443_p2 = pnand %p441_p1, %p438_p0 }
   0x7   :  { %446 = shalt.err (!%p443_p2)
}
   0x8   :  { %s447_s21 = scalar_lea.vmem %s16_s13, 2048  ;;  %p452_p4 = scmp.lt.s32.totalorder %s16_s13, %s16_s13 }
   0x9   :  { %p448_p3 = scmp.ne.s32.totalorder %s16_s13, %s447_s21  ;;  %p453_p5 = scmp.lt.s32.totalorder %s447_s21, %s447_s21 }
   0xb   :  { %p454_p6 = por %p453_p5, %p452_p4 }
   0xd   :  { %p455_p7 = pnand %p454_p6, %p448_p3 }
   0xf   :  { %458 = shalt.err (!%p455_p7)
}
  0x10   :  { %s486_s22 = smov 256   ;;  %s487_s23 = smov 16  }
  0x11   :  { %21 = dma.hbm_to_vmem [thread:$0]  %s565_s0, 2048, %s16_s13, [#allocation3], %s486_s22, %s486_s22, %s487_s23  }
  0x12   :  { %481 = dma.done.wait [#allocation3], 2048  }
  0x13   :  { %482 = vsyncadd [#allocation3], 4294965248  ;;  %v37_v0 = vld [vmem:[#allocation2 + $0x40] sm:$0xff]  ;;  %v38_v1 = vld [vmem:[#allocation2 + $0x48] sm:$0xff]  ;;  %v488_v35 = vmov 0.0|0.0   ;;  %vm489_vm0 = vmmov 0   ;;  %v109_v45 = vlaneseq }
  0x14   :  { %v29_v2 = vld [vmem:[#allocation2] sm:$0xff]  ;;  %v57_v3 = vadd.f32 %v38_v1, %v37_v0  ;;  %v30_v4 = vld [vmem:[#allocation2 + $0x8] sm:$0xff]  ;;  %v39_v5 = vld [vmem:[#allocation2 + $0x50] sm:$0xff]  ;;  %v89_v27 = vmax.f32 %v37_v0, %v38_v1  ;;  %420 = vmatprep.subr.bf16.mxu0 %v488_v35  ;;  %v490_v39 = vmov 0.0   ;;  %vm120_vm1 = vcmask 130112   ;;  %s491_s7 = smov [#allocation5]  }
  0x15   :  { %v40_v6 = vld [vmem:[#allocation2 + $0x58] sm:$0xff]  ;;  %v45_v7 = vadd.f32 %v30_v4, %v29_v2  ;;  %v31_v8 = vld [vmem:[#allocation2 + $0x10] sm:$0xff]  ;;  %v41_v12 = vld [vmem:[#allocation2 + $0x60] sm:$0xff]  ;;  %v77_v25 = vmax.f32 %v29_v2, %v30_v4  ;;  %412 = vmatprep.mubr.msk.f32.mxu0 %vm489_vm0, %v490_v39  ;;  %415 = vmatprep.subr.mxu1 %v490_v39  ;;  %v110_v48 = vand.u32 127, %v109_v45  ;;  %v112_v50 = vshrl.u32 %v109_v45, 7  ;;  %s384_s8 = sshll.u32 %s491_s7, 4  ;;  %s385_s8 = int_to_ptr.vmem [resolvable:$true] %s384_s8 }
  0x16   :  { %v32_v9 = vld [vmem:[#allocation2 + $0x18] sm:$0xff]  ;;  %58 = vadd.xlane.f32.xlu1 %v57_v3  ;;  %v60_v10 = vadd.f32 %v40_v6, %v39_v5  ;;  %v42_v13 = vld [vmem:[#allocation2 + $0x68] sm:$0xff]  ;;  %v33_v14 = vld [vmem:[#allocation2 + $0x20] sm:$0xff]  ;;  %v92_v26 = vmax.f32 %v39_v5, %v40_v6  ;;  %417 = vmatprep.mubr.msk.f32.mxu1 %vm489_vm0, %v490_v39  ;;  %vm127_vm2 = vcmask 195712   ;;  %vm134_vm3 = vcmask 261312   ;;  %p464_p9 = scmp.lt.s32.totalorder %s385_s8, %s385_s8 }
  0x17   :  { %46 = vadd.xlane.f32.xlu0 %v45_v7  ;;  %v48_v11 = vadd.f32 %v32_v9, %v31_v8  ;;  %v34_v15 = vld [vmem:[#allocation2 + $0x28] sm:$0xff]  ;;  %v63_v16 = vadd.f32 %v42_v13, %v41_v12  ;;  %v43_v18 = vld [vmem:[#allocation2 + $0x70] sm:$0xff]  ;;  %v44_v19 = vld [vmem:[#allocation2 + $0x78] sm:$0xff]  ;;  %v80_v24 = vmax.f32 %v31_v8, %v32_v9  ;;  %v95_v28 = vmax.f32 %v41_v12, %v42_v13 }
  0x18   :  { %v51_v17 = vadd.f32 %v34_v15, %v33_v14  ;;  %v35_v20 = vld [vmem:[#allocation2 + $0x30] sm:$0xff]  ;;  %v36_v21 = vld [vmem:[#allocation2 + $0x38] sm:$0xff]  ;;  %v66_v22 = vadd.f32 %v44_v19, %v43_v18  ;;  %v83_v29 = vmax.f32 %v33_v14, %v34_v15  ;;  %v98_v30 = vmax.f32 %v43_v18, %v44_v19  ;;  %v209_v32 = vld [vmem:[%s566_s1] sm:$0xff] }
  0x19   :  { %v54_v23 = vadd.f32 %v36_v21, %v35_v20  ;;  %v86_v31 = vmax.f32 %v35_v20, %v36_v21  ;;  %v210_v33 = vld [vmem:[%s566_s1 + $0x8] sm:$0xff]  ;;  %v211_v36 = vld [vmem:[%s566_s1 + $0x10] sm:$0xff]  ;;  %v212_v37 = vld [vmem:[%s566_s1 + $0x18] sm:$0xff]  ;;  %v115_v51 = vadd.s32 4294967288, %v110_v48  ;;  %v122_v52 = vadd.s32 4294967280, %v110_v48 }
  0x1a   :  { %61 = vadd.xlane.f32.xlu1 %v60_v10  ;;  %v421_v34 = vpack.c.bf16 %v210_v33, %v209_v32  ;;  %v424_v38 = vpack.c.bf16 %v212_v37, %v211_v36  ;;  %v129_v54 = vadd.s32 4294967272, %v110_v48  ;;  %v113_v56 = vsub.s32 %v110_v48, %v112_v50 }
  0x1b   :  { %49 = vadd.xlane.f32.xlu0 %v48_v11  ;;  %v118_v57 = vsub.s32 %v115_v51, %v112_v50  ;;  %v125_v59 = vsub.s32 %v122_v52, %v112_v50  ;;  %vm155_vm4 = vcmask 1041409   ;;  %vm204_vm5 = vcmask 1043459  }
  0x1c   :  { %422 = vmatpush3.bf16.msra.mxu0 %v421_v34  ;;  %v132_v2 = vsub.s32 %v129_v54, %v112_v50  ;;  %vm207_vm6 = vcmask 1041408   ;;  %vm214_vm7 = vcmask 261120   ;;  %vm289_vm8 = vcmask 15360  }
  0x1d   :  { %423 = vmatprep.subr.bf16.mxu0 %v488_v35  ;;  %vm376_vm9 = vcmask 254976  }
  0x1e   :  { %64 = vadd.xlane.f32.xlu1 %v63_v16 }
  0x1f   :  { %52 = vadd.xlane.f32.xlu0 %v51_v17 }
  0x20   :  { %425 = vmatpush3.bf16.msra.mxu0 %v424_v38 }
  0x22   :  { %67 = vadd.xlane.f32.xlu1 %v66_v22 }
  0x23   :  { %55 = vadd.xlane.f32.xlu0 %v54_v23 }
  0x26   :  { %81 = vmax.xlane.f32.xlu1 %v80_v24 }
  0x27   :  { %78 = vmax.xlane.f32.xlu0 %v77_v25 }
  0x2a   :  { %93 = vmax.xlane.f32.xlu1 %v92_v26 }
  0x2b   :  { %90 = vmax.xlane.f32.xlu0 %v89_v27 }
  0x2e   :  { %96 = vmax.xlane.f32.xlu1 %v95_v28 }
  0x2f   :  { %84 = vmax.xlane.f32.xlu0 %v83_v29 }
  0x32   :  { %99 = vmax.xlane.f32.xlu1 %v98_v30 }
  0x33   :  { %87 = vmax.xlane.f32.xlu0 %v86_v31 }
  0xa3   :  { %v59_v40 = vpop.xlane.xlu1 %58 }
  0xa4   :  { %v47_v41 = vpop.xlane.xlu0 %46  ;;  %v73_v60 = vmul.f32 0.00390625, %v59_v40 }
  0xa5   :  { %v69_v61 = vmul.f32 0.00390625, %v47_v41  ;;  %v213_v41 = vld [vmem:[%s567_s2] sm:$0x3]  ;;  %s459_s2 = scalar_lea.vmem %s385_s8, 32 }
  0xa6   :  { %v139_v7 = vrot.slane %v73_v60, %v113_v56  ;;  %416 = vmatpush3.msk.msra.mxu1 %vm207_vm6, %v213_v41  ;;  %p460_p8 = scmp.ne.s32.totalorder %s385_s8, %s459_s2  ;;  %p465_p10 = scmp.lt.s32.totalorder %s459_s2, %s459_s2 }
  0xa7   :  { %v62_v42 = vpop.xlane.xlu1 %61  ;;  %v114_v8 = vrot.slane %v69_v61, %v113_v56 }
  0xa8   :  { %v50_v43 = vpop.xlane.xlu0 %49  ;;  %v74_v58 = vmul.f32 0.00390625, %v62_v42  ;;  %p466_p11 = por %p465_p10, %p464_p9 }
  0xa9   :  { %v70_v62 = vmul.f32 0.00390625, %v50_v43 }
  0xaa   :  { %v143_v6 = vrot.slane %v74_v58, %v118_v57  ;;  %p467_p12 = pnand %p466_p11, %p460_p8 }
  0xab   :  { %v65_v44 = vpop.xlane.xlu1 %64  ;;  %v119_v9 = vrot.slane %v70_v62, %v118_v57 }
  0xac   :  { %v53_v46 = vpop.xlane.xlu0 %52  ;;  %v75_v63 = vmul.f32 0.00390625, %v65_v44  ;;  %v144_v21 = vsel %vm120_vm1, %v143_v6, %v139_v7 }
  0xad   :  { %v71_v1 = vmul.f32 0.00390625, %v53_v46  ;;  %v121_v23 = vsel %vm120_vm1, %v119_v9, %v114_v8 }
  0xae   :  { %v148_v10 = vrot.slane %v75_v63, %v125_v59 }
  0xaf   :  { %v68_v47 = vpop.xlane.xlu1 %67  ;;  %v126_v12 = vrot.slane %v71_v1, %v125_v59 }
  0xb0   :  { %v56_v49 = vpop.xlane.xlu0 %55  ;;  %v76_v3 = vmul.f32 0.00390625, %v68_v47  ;;  %v149_v24 = vsel %vm127_vm2, %v148_v10, %v144_v21 }
  0xb1   :  { %v72_v5 = vmul.f32 0.00390625, %v56_v49  ;;  %v128_v26 = vsel %vm127_vm2, %v126_v12, %v121_v23 }
  0xb2   :  { %v153_v13 = vrot.slane %v76_v3, %v132_v2 }
  0xb3   :  { %v82_v53 = vpop.xlane.xlu1 %81  ;;  %v133_v17 = vrot.slane %v72_v5, %v132_v2 }
  0xb4   :  { %v79_v55 = vpop.xlane.xlu0 %78  ;;  %v173_v18 = vrot.slane %v82_v53, %v118_v57  ;;  %v154_v27 = vsel %vm134_vm3, %v153_v13, %v149_v24 }
  0xb5   :  { %v169_v19 = vrot.slane %v79_v55, %v113_v56  ;;  %v135_v31 = vsel %vm134_vm3, %v133_v17, %v128_v26 }
  0xb6   :  { %v156_v38 = vsel %vm155_vm4, %v154_v27, %v135_v31 }
  0xb7   :  { %v94_v0 = vpop.xlane.xlu1 %93  ;;  %v174_v32 = vsel %vm120_vm1, %v173_v18, %v169_v19 }
  0xb8   :  { %v91_v4 = vpop.xlane.xlu0 %90  ;;  %v192_v14 = vrot.slane %v94_v0, %v118_v57 }
  0xb9   :  { %v188_v15 = vrot.slane %v91_v4, %v113_v56 }
  0xbb   :  { %v97_v11 = vpop.xlane.xlu1 %96  ;;  %v193_v28 = vsel %vm120_vm1, %v192_v14, %v188_v15 }
  0xbc   :  { %v85_v16 = vpop.xlane.xlu0 %84  ;;  %v197_v20 = vrot.slane %v97_v11, %v125_v59 }
  0xbd   :  { %v178_v22 = vrot.slane %v85_v16, %v125_v59 }
  0xbe   :  { %v198_v33 = vsel %vm127_vm2, %v197_v20, %v193_v28 }
  0xbf   :  { %v100_v25 = vpop.xlane.xlu1 %99  ;;  %v179_v35 = vsel %vm127_vm2, %v178_v22, %v174_v32 }
  0xc0   :  { %v202_v29 = vrot.slane %v100_v25, %v132_v2  ;;  %v88_v30 = vpop.xlane.xlu0 %87 }
  0xc1   :  { %v183_v34 = vrot.slane %v88_v30, %v132_v2 }
  0xc2   :  { %v203_v36 = vsel %vm134_vm3, %v202_v29, %v198_v33 }
  0xc3   :  { %v184_v37 = vsel %vm134_vm3, %v183_v34, %v179_v35 }
  0xc4   :  { %v205_v39 = vsel %vm204_vm5, %v203_v36, %v184_v37 }
  0xc5   :  { %v208_v40 = vsel %vm207_vm6, %v156_v38, %v205_v39 }
  0xc6   :  { %413 = vmatmul.mubr.msk.f32.vlgmr.msra.gmra.mrb[0].mxu0 %vm214_vm7, %v208_v40 }
 0x199   :  { %v284_v42 = vpop.f32.mrb[0].mxu0 }
 0x19a   :  { %v288_v43 = vmax.f32 %v284_v42, 0.0  ;;  %v414_v44 = vpop.f32.mrb[1].mxu0 }
 0x19c   :  { %418 = vmatmul.mubr.msk.f32.vlgmr.msra.gmra.mrb[0].mxu1 %vm289_vm8, %v288_v43 }
 0x26f   :  { %v362_v45 = vpop.f32.mrb[0].mxu1 }
 0x270   :  { %v367_v46 = vrot.slane %v362_v45, 2  ;;  %v419_v47 = vpop.f32.mrb[1].mxu1 }
 0x272   :  { %v369_v48 = vadd.f32 %v367_v46, %v362_v45 }
 0x274   :  { %v396_v49 = vmul.f32 -1.442695, %v369_v48 }
 0x276   :  { %433 = vpow2.f32 %v396_v49 }
 0x280   :  { %v434_v50 = vpop.eup %433 }
 0x281   :  { %v373_v51 = vadd.f32 1.0, %v434_v50 }
 0x283   :  { %435 = vrcp.f32 %v373_v51 }
 0x28d   :  { %v436_v52 = vpop.eup %435 }
 0x28e   :  { %377 = vst.msk [vmem:[#allocation5] sm:$0x3] %vm376_vm9, %v436_v52 }
 0x28f   :  { %470 = shalt.err (!%p467_p12)
}
 0x290   :  { %s471_s11 = scalar_lea.hbm %s568_s3, 32 }
 0x291   :  { %p472_p13 = scmp.ne.s32.totalorder %s568_s3, %s471_s11  ;;  %p475_p0 = scmp.lt.u32.totalorder %s471_s11, %s568_s3 }
 0x293   :  { %p477_p1 = pnand %p475_p0, %p472_p13 }
 0x295   :  { %480 = shalt.err (!%p477_p1)
}
 0x296   :  { %387 = dma.vmem_to_hbm [thread:$0]  %s385_s8, 32, %s568_s3, [#allocation4]  }
 0x297   :  { %483 = dma.done.wait [#allocation4], 32  }
 0x298   :  { %484 = vsyncadd [#allocation4], 4294967264 }
 0x299   :  { %391 = vsyncpa [#allocation3], 1 }
 0x29a   :  { %392 = vsyncpa [#allocation4], 1 }

</bundles_post_ra>
